<compile_context>
chip_gen: v5e
topology: v5e:2x2
jax: 0.10.0
libtpu: 0.0.40
codegen_flags: <defaults>
</compile_context>

<pallas_src>
import jax
import jax.numpy as jnp
import numpy as np
from jax import lax
from jax.experimental import pallas as pl
from jax.experimental.pallas import tpu as pltpu

HIDDEN = 50


def value_net_kernel(x_ref, w1_ref, b1_ref, w2_ref, b2_ref,
                     w3_ref, b3_ref, w4_ref, b4_ref, o_ref):
    # Fused MLP hot path: 4 matmuls + 3 tanh, batch on the lane axis throughout.
    x = x_ref[...]                                                 # (bm, sd)
    # Layer 1: W1 (50, sd) contracted with x (bm, sd) over their last dims -> (50, bm).
    h = lax.dot_general(w1_ref[...], x, (((1,), (1,)), ((), ())),
                        preferred_element_type=jnp.float32)
    h = jnp.tanh(h + b1_ref[...])                                  # (50, bm)
    h = jnp.tanh(jnp.dot(w2_ref[...], h,
                         preferred_element_type=jnp.float32) + b2_ref[...])
    h = jnp.tanh(jnp.dot(w3_ref[...], h,
                         preferred_element_type=jnp.float32) + b3_ref[...])
    # Head: (1, 50) @ (50, bm) -> (1, bm); lane-dense, unmasked vst, no transpose.
    v = jnp.dot(w4_ref[...], h, preferred_element_type=jnp.float32) + b4_ref[...]
    o_ref[...] = v.astype(o_ref.dtype)


def _pick_batch_tile(batch, bm_request):
    """Batch tile: multiple of 128 (lane-dense (1, bm) output block), capped at 2048,
    and capped at the lane-padded batch.  No forced multi-step split: on single-TC
    v5e/v6e the grid is a serial loop, so fewer / fatter tiles amortize the ~0.35 us
    per-step overhead; larger batches still yield multiple 'parallel' steps for v7x."""
    b_lanes = pl.cdiv(batch, 128) * 128
    bm = min(max((bm_request // 128) * 128, 128), 2048)
    bm = min(bm, b_lanes)
    b_pad = pl.cdiv(b_lanes, bm) * bm
    return bm, b_pad


def value_network_forward(states, params, *, bm=1024):
    """states: (B, state_dim) float32. Returns (B, 1) float32."""
    w1, b1, w2, b2, w3, b3, w4, b4 = params
    B, state_dim = states.shape
    hidden = w1.shape[0]

    bm, B_pad = _pick_batch_tile(B, bm)
    if B_pad != B:
        states = jnp.pad(states, ((0, B_pad - B), (0, 0)))
    grid = B_pad // bm

    # Weights/biases are tiny; full-array blocks, constant index_map -> DMA'd once,
    # resident across all grid steps.
    def full_spec(shape):
        return pl.BlockSpec(shape, lambda i: (0,) * len(shape))

    weight_bytes = sum(int(np.prod(p.shape)) * 4
                       for p in (w1, b1, w2, b2, w3, b3, w4, b4))
    cost = pl.CostEstimate(
        flops=2 * B_pad * (state_dim * hidden + 2 * hidden * hidden + hidden),
        transcendentals=3 * B_pad * hidden,
        bytes_accessed=B_pad * state_dim * 4 + B_pad * 4 + weight_bytes,
    )

    out = pl.pallas_call(
        value_net_kernel,
        out_shape=jax.ShapeDtypeStruct((1, B_pad), jnp.float32),
        grid_spec=pltpu.PrefetchScalarGridSpec(
            num_scalar_prefetch=0,
            grid=(grid,),
            in_specs=[
                pl.BlockSpec((bm, state_dim), lambda i: (i, 0)),   # states tile
                full_spec(w1.shape), full_spec(b1.shape),
                full_spec(w2.shape), full_spec(b2.shape),
                full_spec(w3.shape), full_spec(b3.shape),
                full_spec(w4.shape), full_spec(b4.shape),
            ],
            out_specs=pl.BlockSpec((1, bm), lambda i: (0, i)),
        ),
        compiler_params=pltpu.CompilerParams(
            dimension_semantics=("parallel",)),
        cost_estimate=cost,
    )(states, w1, b1, w2, b2, w3, b3, w4, b4)

    # (1, B_pad) lane-dense slab -> (B, 1) column expected by callers.
    return out[0, :B].reshape(B, 1)


def init_params(key, state_dim, hidden=HIDDEN, out_dim=1):
    """Deterministic init mimicking torch Linear U(-1/sqrt(fan_in), 1/sqrt(fan_in)).
    Weights in torch (out_features, in_features) layout, biases (out_features, 1)."""
    dims = [(state_dim, hidden), (hidden, hidden), (hidden, hidden), (hidden, out_dim)]
    params = []
    for fan_in, fan_out in dims:
        key, kw, kb = jax.random.split(key, 3)
        bound = 1.0 / np.sqrt(fan_in)
        w = jax.random.uniform(kw, (fan_out, fan_in), jnp.float32, -bound, bound)
        b = jax.random.uniform(kb, (fan_out, 1), jnp.float32, -bound, bound)
        params.extend([w, b])
    return tuple(params)


def value_network_ref(states, params):
    w1, b1, w2, b2, w3, b3, w4, b4 = params
    h = jnp.tanh(states @ w1.T + b1.T)
    h = jnp.tanh(h @ w2.T + b2.T)
    h = jnp.tanh(h @ w3.T + b3.T)
    return h @ w4.T + b4.T


if __name__ == "__main__":
    key = jax.random.PRNGKey(0)
    key, kx1, kx2 = jax.random.split(key, 3)

    state_dim = 32
    params = init_params(key, state_dim)

    # Small batch: pads up to a single 128-row tile.
    states_small = jax.random.normal(kx1, (8, state_dim), jnp.float32)
    out_small = jax.block_until_ready(value_network_forward(states_small, params))
    np.testing.assert_allclose(np.asarray(out_small),
                               np.asarray(value_network_ref(states_small, params)),
                               rtol=2e-5, atol=2e-5)
    assert out_small.shape == (8, 1)

    # Non-multiple batch: exercises cdiv padding + a multi-step "parallel" grid.
    states_big = jax.random.normal(kx2, (1300, state_dim), jnp.float32)
    out_big = jax.block_until_ready(value_network_forward(states_big, params))
    np.testing.assert_allclose(np.asarray(out_big),
                               np.asarray(value_network_ref(states_big, params)),
                               rtol=2e-5, atol=2e-5)
    assert out_big.shape == (1300, 1)

    print("KERNEL_OK")
</pallas_src>

<mosaic_0001>
module attributes {stable_mosaic.version = 11 : i64} {
  func.func @value_net_kernel(%arg0: i32, %arg1: memref<128x32xf32, #tpu.memory_space<vmem>>, %arg2: memref<50x32xf32, #tpu.memory_space<vmem>>, %arg3: memref<50x1xf32, #tpu.memory_space<vmem>>, %arg4: memref<50x50xf32, #tpu.memory_space<vmem>>, %arg5: memref<50x1xf32, #tpu.memory_space<vmem>>, %arg6: memref<50x50xf32, #tpu.memory_space<vmem>>, %arg7: memref<50x1xf32, #tpu.memory_space<vmem>>, %arg8: memref<1x50xf32, #tpu.memory_space<vmem>>, %arg9: memref<1x1xf32, #tpu.memory_space<vmem>>, %arg10: memref<1x128xf32, #tpu.memory_space<vmem>>) attributes {dimension_semantics = [#tpu.dimension_semantics<parallel>], iteration_bounds = array<i64: 1>, scalar_prefetch = 0 : i64, scratch_operands = 0 : i64, tpu.core_type = #tpu.core_type<tc>, window_params = [{transform_indices = @transform_0, window_bounds = array<i64: 128, 32>}, {pipeline_mode = #tpu.pipeline_mode<synchronous>, transform_indices = @transform_1, window_bounds = array<i64: 50, 32>}, {pipeline_mode = #tpu.pipeline_mode<synchronous>, transform_indices = @transform_2, window_bounds = array<i64: 50, 1>}, {pipeline_mode = #tpu.pipeline_mode<synchronous>, transform_indices = @transform_3, window_bounds = array<i64: 50, 50>}, {pipeline_mode = #tpu.pipeline_mode<synchronous>, transform_indices = @transform_4, window_bounds = array<i64: 50, 1>}, {pipeline_mode = #tpu.pipeline_mode<synchronous>, transform_indices = @transform_5, window_bounds = array<i64: 50, 50>}, {pipeline_mode = #tpu.pipeline_mode<synchronous>, transform_indices = @transform_6, window_bounds = array<i64: 50, 1>}, {pipeline_mode = #tpu.pipeline_mode<synchronous>, transform_indices = @transform_7, window_bounds = array<i64: 1, 50>}, {pipeline_mode = #tpu.pipeline_mode<synchronous>, transform_indices = @transform_8, window_bounds = array<i64: 1, 1>}, {transform_indices = @transform_9, window_bounds = array<i64: 1, 128>}]} {
    %c0 = arith.constant 0 : index
    %c0_0 = arith.constant 0 : index
    %0 = vector.load %arg1[%c0, %c0_0] : memref<128x32xf32, #tpu.memory_space<vmem>>, vector<128x32xf32>
    %c0_1 = arith.constant 0 : index
    %c0_2 = arith.constant 0 : index
    %1 = vector.load %arg2[%c0_1, %c0_2] : memref<50x32xf32, #tpu.memory_space<vmem>>, vector<50x32xf32>
    %cst = arith.constant dense<0.000000e+00> : vector<50x128xf32>
    %2 = tpu.matmul %1, %0, %cst {dimension_numbers = #tpu.dot_dimension_numbers<[1], [1], [0], [0], [0, 0, 1, 0], [], []>} : vector<50x32xf32>, vector<128x32xf32>, vector<50x128xf32> -> vector<50x128xf32>
    %c0_3 = arith.constant 0 : index
    %c0_4 = arith.constant 0 : index
    %3 = vector.load %arg3[%c0_3, %c0_4] : memref<50x1xf32, #tpu.memory_space<vmem>>, vector<50x1xf32>
    %4 = vector.broadcast %3 : vector<50x1xf32> to vector<50x128xf32>
    %5 = arith.addf %2, %4 : vector<50x128xf32>
    %6 = math.tanh %5 : vector<50x128xf32>
    %c0_5 = arith.constant 0 : index
    %c0_6 = arith.constant 0 : index
    %7 = vector.load %arg4[%c0_5, %c0_6] : memref<50x50xf32, #tpu.memory_space<vmem>>, vector<50x50xf32>
    %cst_7 = arith.constant dense<0.000000e+00> : vector<50x128xf32>
    %8 = tpu.matmul %7, %6, %cst_7 {dimension_numbers = #tpu.dot_dimension_numbers<[1], [0], [0], [1], [0, 0, 1, 1], [], []>} : vector<50x50xf32>, vector<50x128xf32>, vector<50x128xf32> -> vector<50x128xf32>
    %c0_8 = arith.constant 0 : index
    %c0_9 = arith.constant 0 : index
    %9 = vector.load %arg5[%c0_8, %c0_9] : memref<50x1xf32, #tpu.memory_space<vmem>>, vector<50x1xf32>
    %10 = vector.broadcast %9 : vector<50x1xf32> to vector<50x128xf32>
    %11 = arith.addf %8, %10 : vector<50x128xf32>
    %12 = math.tanh %11 : vector<50x128xf32>
    %c0_10 = arith.constant 0 : index
    %c0_11 = arith.constant 0 : index
    %13 = vector.load %arg6[%c0_10, %c0_11] : memref<50x50xf32, #tpu.memory_space<vmem>>, vector<50x50xf32>
    %cst_12 = arith.constant dense<0.000000e+00> : vector<50x128xf32>
    %14 = tpu.matmul %13, %12, %cst_12 {dimension_numbers = #tpu.dot_dimension_numbers<[1], [0], [0], [1], [0, 0, 1, 1], [], []>} : vector<50x50xf32>, vector<50x128xf32>, vector<50x128xf32> -> vector<50x128xf32>
    %c0_13 = arith.constant 0 : index
    %c0_14 = arith.constant 0 : index
    %15 = vector.load %arg7[%c0_13, %c0_14] : memref<50x1xf32, #tpu.memory_space<vmem>>, vector<50x1xf32>
    %16 = vector.broadcast %15 : vector<50x1xf32> to vector<50x128xf32>
    %17 = arith.addf %14, %16 : vector<50x128xf32>
    %18 = math.tanh %17 : vector<50x128xf32>
    %c0_15 = arith.constant 0 : index
    %c0_16 = arith.constant 0 : index
    %19 = vector.load %arg8[%c0_15, %c0_16] : memref<1x50xf32, #tpu.memory_space<vmem>>, vector<1x50xf32>
    %cst_17 = arith.constant dense<0.000000e+00> : vector<1x128xf32>
    %20 = tpu.matmul %19, %18, %cst_17 {dimension_numbers = #tpu.dot_dimension_numbers<[1], [0], [0], [1], [0, 0, 1, 1], [], []>} : vector<1x50xf32>, vector<50x128xf32>, vector<1x128xf32> -> vector<1x128xf32>
    %c0_18 = arith.constant 0 : index
    %c0_19 = arith.constant 0 : index
    %21 = vector.load %arg9[%c0_18, %c0_19] : memref<1x1xf32, #tpu.memory_space<vmem>>, vector<1x1xf32>
    %22 = vector.broadcast %21 : vector<1x1xf32> to vector<1x128xf32>
    %23 = arith.addf %20, %22 : vector<1x128xf32>
    %c0_20 = arith.constant 0 : index
    %c0_21 = arith.constant 0 : index
    %24 = vector.load %arg10[%c0_20, %c0_21] : memref<1x128xf32, #tpu.memory_space<vmem>>, vector<1x128xf32>
    tpu.vector_store %arg10[%c0_20, %c0_21], %23 {strides = array<i32>} : memref<1x128xf32, #tpu.memory_space<vmem>>, vector<1x128xf32>,
    return
  }
  func.func @transform_0(%arg0: i32) -> (i32, i32) {
    %c0_i32 = arith.constant 0 : i32
    %c0_i32_0 = arith.constant 0 : i32
    return %arg0, %c0_i32 : i32, i32
  }
  func.func @transform_1(%arg0: i32) -> (i32, i32) {
    %c0_i32 = arith.constant 0 : i32
    %c0_i32_0 = arith.constant 0 : i32
    %c0_i32_1 = arith.constant 0 : i32
    return %c0_i32, %c0_i32_0 : i32, i32
  }
  func.func @transform_2(%arg0: i32) -> (i32, i32) {
    %c0_i32 = arith.constant 0 : i32
    %c0_i32_0 = arith.constant 0 : i32
    %c0_i32_1 = arith.constant 0 : i32
    return %c0_i32, %c0_i32_0 : i32, i32
  }
  func.func @transform_3(%arg0: i32) -> (i32, i32) {
    %c0_i32 = arith.constant 0 : i32
    %c0_i32_0 = arith.constant 0 : i32
    %c0_i32_1 = arith.constant 0 : i32
    return %c0_i32, %c0_i32_0 : i32, i32
  }
  func.func @transform_4(%arg0: i32) -> (i32, i32) {
    %c0_i32 = arith.constant 0 : i32
    %c0_i32_0 = arith.constant 0 : i32
    %c0_i32_1 = arith.constant 0 : i32
    return %c0_i32, %c0_i32_0 : i32, i32
  }
  func.func @transform_5(%arg0: i32) -> (i32, i32) {
    %c0_i32 = arith.constant 0 : i32
    %c0_i32_0 = arith.constant 0 : i32
    %c0_i32_1 = arith.constant 0 : i32
    return %c0_i32, %c0_i32_0 : i32, i32
  }
  func.func @transform_6(%arg0: i32) -> (i32, i32) {
    %c0_i32 = arith.constant 0 : i32
    %c0_i32_0 = arith.constant 0 : i32
    %c0_i32_1 = arith.constant 0 : i32
    return %c0_i32, %c0_i32_0 : i32, i32
  }
  func.func @transform_7(%arg0: i32) -> (i32, i32) {
    %c0_i32 = arith.constant 0 : i32
    %c0_i32_0 = arith.constant 0 : i32
    %c0_i32_1 = arith.constant 0 : i32
    return %c0_i32, %c0_i32_0 : i32, i32
  }
  func.func @transform_8(%arg0: i32) -> (i32, i32) {
    %c0_i32 = arith.constant 0 : i32
    %c0_i32_0 = arith.constant 0 : i32
    %c0_i32_1 = arith.constant 0 : i32
    return %c0_i32, %c0_i32_0 : i32, i32
  }
  func.func @transform_9(%arg0: i32) -> (i32, i32) {
    %c0_i32 = arith.constant 0 : i32
    %c0_i32_0 = arith.constant 0 : i32
    return %c0_i32, %arg0 : i32, i32
  }
}

</mosaic_0001>

<bundles_post_ra>
// kernel: tpu_custom_call.1
= control target key start
LH: loop header
LB: loop body
LE: loop exit
PB: predicated region body
PF: predicated region fallthrough
CT: control target
= control target key end

     0   :  { %s926_s0 = inlined_call_operand.vmem [shape: f32[128,32], index: 0, kind: input, shape index: {}]   ;;  %s927_s1 = inlined_call_operand.vmem [shape: f32[50,32], index: 1, kind: input, shape index: {}]   ;;  %s928_s2 = inlined_call_operand.vmem [shape: f32[50,1], index: 2, kind: input, shape index: {}]   ;;  %s929_s3 = inlined_call_operand.vmem [shape: f32[50,50], index: 3, kind: input, shape index: {}]   ;;  %s930_s4 = inlined_call_operand.vmem [shape: f32[50,1], index: 4, kind: input, shape index: {}]   ;;  %s931_s5 = inlined_call_operand.vmem [shape: f32[50,50], index: 5, kind: input, shape index: {}]   ;;  %s932_s6 = inlined_call_operand.vmem [shape: f32[50,1], index: 6, kind: input, shape index: {}]   ;;  %s933_s7 = inlined_call_operand.vmem [shape: f32[1,50], index: 7, kind: input, shape index: {}]   ;;  %s934_s8 = inlined_call_operand.<no memory space> [shape: f32[1,1], index: 8, kind: input, shape index: {}]   ;;  %s935_s9 = inlined_call_operand.hbm [shape: f32[1,128], index: 9, kind: output, shape index: {}]  }
   0x1   :  { %v14_v0 = vstv %s934_s8 }
   0x2   :  { %15 = vst [vmem:[#allocation2] sm:$0x1] %v14_v0 }
   0x3   :  { %v50_v1 = vld [vmem:[%s926_s0 + $0x78] sm:$0xff]  ;;  %vm100_vm0 = vcmask 261120   ;;  %v49_v2 = vld [vmem:[%s926_s0 + $0x70] sm:$0xff] }
   0x4   :  { %545 = vmatpush.xpose.msk.msra.mxu3 %vm100_vm0, %v50_v1  ;;  %504 = vmatpush.xpose.msk.msra.mxu0 %vm100_vm0, %v50_v1 }
   0x5   :  { %16 = vsyncpa [#allocation4], 0  ;;  %v48_v3 = vld [vmem:[%s926_s0 + $0x68] sm:$0xff]  ;;  %v64_v4 = vld [vmem:[%s928_s2 + $0x30] sm:$0x3]  ;;  %v634_v6 = vmov 0  }
   0x6   :  { %v47_v5 = vld [vmem:[%s926_s0 + $0x60] sm:$0xff]  ;;  %563 = vset.pattern.permute.xlu0 %v634_v6  ;;  %564 = vset.pattern.permute.xlu1 %v634_v6  ;;  %v46_v7 = vld [vmem:[%s926_s0 + $0x58] sm:$0xff]  ;;  %v63_v8 = vld [vmem:[%s928_s2 + $0x28] sm:$0xff]  ;;  %vm286_vm1 = vcmask 1041408   ;;  %vm264_vm2 = vcmask 408576  }
   0x7   :  { %97 = vperm.xlu0 %563, %v64_v4   ;;  %565 = vset.pattern.permute.xlu2 %v634_v6  ;;  %v45_v9 = vld [vmem:[%s926_s0 + $0x50] sm:$0xff]  ;;  %v62_v10 = vld [vmem:[%s928_s2 + $0x20] sm:$0xff]  ;;  %v44_v11 = vld [vmem:[%s926_s0 + $0x48] sm:$0xff] }
   0x8   :  { %546 = vmatpush.xpose.msk.msra.mxu3 %vm100_vm0, %v49_v2  ;;  %505 = vmatpush.xpose.msk.msra.mxu0 %vm100_vm0, %v49_v2  ;;  %v58_v12 = vld [vmem:[%s928_s2] sm:$0xff]  ;;  %v61_v14 = vld [vmem:[%s928_s2 + $0x18] sm:$0xff]  ;;  %v41_v17 = vld [vmem:[%s926_s0 + $0x30] sm:$0xff] }
   0x9   :  { %87 = vperm.xlu1 %564, %v62_v10   ;;  %v43_v13 = vld [vmem:[%s926_s0 + $0x40] sm:$0xff]  ;;  %v42_v15 = vld [vmem:[%s926_s0 + $0x38] sm:$0xff]  ;;  %v228_v18 = vld [vmem:[%s930_s4 + $0x30] sm:$0x3] }
   0xa   :  { %v226_v16 = vld [vmem:[%s930_s4 + $0x20] sm:$0xff]  ;;  %v40_v19 = vld [vmem:[%s926_s0 + $0x28] sm:$0xff]  ;;  %v225_v22 = vld [vmem:[%s930_s4 + $0x18] sm:$0xff] }
   0xb   :  { %v223_v20 = vld [vmem:[%s930_s4 + $0x8] sm:$0xff]  ;;  %v39_v21 = vld [vmem:[%s926_s0 + $0x20] sm:$0xff]  ;;  %v38_v23 = vld [vmem:[%s926_s0 + $0x18] sm:$0xff] }
   0xc   :  { %547 = vmatpush.xpose.msk.msra.mxu3 %vm100_vm0, %v48_v3  ;;  %506 = vmatpush.xpose.msk.msra.mxu0 %vm100_vm0, %v48_v3  ;;  %v60_v24 = vld [vmem:[%s928_s2 + $0x10] sm:$0xff]  ;;  %v347_v25 = vld [vmem:[%s932_s6 + $0x28] sm:$0xff]  ;;  %v222_v27 = vld [vmem:[%s930_s4] sm:$0xff] }
   0xd   :  { %v37_v26 = vld [vmem:[%s926_s0 + $0x10] sm:$0xff]  ;;  %77 = vperm.xlu2 %565, %v60_v24   ;;  %v36_v28 = vld [vmem:[%s926_s0 + $0x8] sm:$0xff]  ;;  %v35_v31 = vld [vmem:[%s926_s0] sm:$0xff]  ;;  %s495_s0 = sshll.u32 %s935_s9, 4  ;;  %s496_s0 = int_to_ptr.hbm [resolvable:$true] %s495_s0 }
   0xe   :  { %v59_v29 = vld [vmem:[%s928_s2 + $0x8] sm:$0xff]  ;;  %v344_v30 = vld [vmem:[%s932_s6 + $0x10] sm:$0xff]  ;;  %v346_v32 = vld [vmem:[%s932_s6 + $0x20] sm:$0xff] }
   0xf   :  { %92 = vperm.xlu0 %563, %v63_v8   ;;  %v54_v33 = vld [vmem:[%s927_s1 + $0x18] sm:$0xff]  ;;  %v51_v34 = vld [vmem:[%s927_s1] sm:$0xff]  ;;  %v227_v35 = vld [vmem:[%s930_s4 + $0x28] sm:$0xff] }
  0x10   :  { %548 = vmatpush.xpose.msk.msra.mxu3 %vm100_vm0, %v47_v5  ;;  %507 = vmatpush.xpose.msk.msra.mxu0 %vm100_vm0, %v47_v5  ;;  %v454_v36 = vld [vmem:[#allocation2] sm:$0x1]  ;;  %v343_v37 = vld [vmem:[%s932_s6 + $0x8] sm:$0xff]  ;;  %v224_v40 = vld [vmem:[%s930_s4 + $0x10] sm:$0xff] }
  0x11   :  { %82 = vperm.xlu1 %564, %v61_v14   ;;  %v55_v38 = vld [vmem:[%s927_s1 + $0x20] sm:$0xff]  ;;  %v52_v39 = vld [vmem:[%s927_s1 + $0x8] sm:$0xff]  ;;  %v53_v42 = vld [vmem:[%s927_s1 + $0x10] sm:$0xff] }
  0x12   :  { %v56_v41 = vld [vmem:[%s927_s1 + $0x28] sm:$0xff]  ;;  %v348_v43 = vld [vmem:[%s932_s6 + $0x30] sm:$0x3]  ;;  %v345_v45 = vld [vmem:[%s932_s6 + $0x18] sm:$0xff] }
  0x13   :  { %v57_v44 = vld [vmem:[%s927_s1 + $0x30] sm:$0x3]  ;;  %v342_v46 = vld [vmem:[%s932_s6] sm:$0xff]  ;;  %v218_v14 = vld [vmem:[%s929_s3 + $0x18] sm:$0xff]  ;;  %s635_s6 = smov [#allocation3]  }
  0x14   :  { %549 = vmatpush.xpose.msk.msra.mxu3 %vm100_vm0, %v46_v7  ;;  %508 = vmatpush.xpose.msk.msra.mxu0 %vm100_vm0, %v46_v7  ;;  %v215_v10 = vld [vmem:[%s929_s3] sm:$0xff]  ;;  %s493_s28 = sshll.u32 %s635_s6, 4  ;;  %s494_s28 = int_to_ptr.vmem [resolvable:$true] %s493_s28 }
  0x15   :  { %72 = vperm.xlu2 %565, %v59_v29  }
  0x17   :  { %67 = vperm.xlu0 %563, %v58_v12   ;;  %v216_v12 = vld [vmem:[%s929_s3 + $0x8] sm:$0xff] }
  0x18   :  { %550 = vmatpush.xpose.msk.msra.mxu3 %vm100_vm0, %v45_v9  ;;  %509 = vmatpush.xpose.msk.msra.mxu0 %vm100_vm0, %v45_v9 }
  0x19   :  { %261 = vperm.xlu1 %564, %v228_v18  }
  0x1c   :  { %551 = vmatpush.xpose.msk.msra.mxu3 %vm100_vm0, %v44_v11  ;;  %510 = vmatpush.xpose.msk.msra.mxu0 %vm100_vm0, %v44_v11 }
  0x1d   :  { %256 = vperm.xlu2 %565, %v227_v35  }
  0x1f   :  { %251 = vperm.xlu0 %563, %v226_v16   ;;  %v220_v16 = vld [vmem:[%s929_s3 + $0x28] sm:$0xff] }
  0x20   :  { %552 = vmatpush.xpose.msk.msra.mxu3 %vm100_vm0, %v43_v13  ;;  %511 = vmatpush.xpose.msk.msra.mxu0 %vm100_vm0, %v43_v13  ;;  %v217_v13 = vld [vmem:[%s929_s3 + $0x10] sm:$0xff] }
  0x21   :  { %246 = vperm.xlu1 %564, %v225_v22  }
  0x24   :  { %553 = vmatpush.xpose.msk.msra.mxu3 %vm100_vm0, %v42_v15  ;;  %512 = vmatpush.xpose.msk.msra.mxu0 %vm100_vm0, %v42_v15  ;;  %v219_v15 = vld [vmem:[%s929_s3 + $0x20] sm:$0xff] }
  0x25   :  { %241 = vperm.xlu2 %565, %v224_v40  }
  0x27   :  { %236 = vperm.xlu0 %563, %v223_v20  }
  0x28   :  { %554 = vmatpush.xpose.msk.msra.mxu3 %vm100_vm0, %v41_v17  ;;  %513 = vmatpush.xpose.msk.msra.mxu0 %vm100_vm0, %v41_v17  ;;  %v221_v17 = vld [vmem:[%s929_s3 + $0x30] sm:$0x3] }
  0x29   :  { %231 = vperm.xlu1 %564, %v222_v27  }
  0x2c   :  { %555 = vmatpush.xpose.msk.msra.mxu3 %vm100_vm0, %v40_v19  ;;  %514 = vmatpush.xpose.msk.msra.mxu0 %vm100_vm0, %v40_v19 }
  0x2d   :  { %381 = vperm.xlu2 %565, %v348_v43  }
  0x2f   :  { %376 = vperm.xlu0 %563, %v347_v25  }
  0x30   :  { %556 = vmatpush.xpose.msk.msra.mxu3 %vm100_vm0, %v39_v21  ;;  %515 = vmatpush.xpose.msk.msra.mxu0 %vm100_vm0, %v39_v21 }
  0x31   :  { %371 = vperm.xlu1 %564, %v346_v32  }
  0x34   :  { %557 = vmatpush.xpose.msk.msra.mxu3 %vm100_vm0, %v38_v23  ;;  %516 = vmatpush.xpose.msk.msra.mxu0 %vm100_vm0, %v38_v23 }
  0x35   :  { %366 = vperm.xlu2 %565, %v345_v45   ;;  %v335_v45 = vld [vmem:[%s931_s5] sm:$0xff] }
  0x37   :  { %361 = vperm.xlu0 %563, %v344_v30  }
  0x38   :  { %558 = vmatpush.xpose.msk.msra.mxu3 %vm100_vm0, %v37_v26  ;;  %517 = vmatpush.xpose.msk.msra.mxu0 %vm100_vm0, %v37_v26 }
  0x39   :  { %356 = vperm.xlu1 %564, %v343_v37  }
  0x3c   :  { %559 = vmatpush.xpose.msk.msra.mxu3 %vm100_vm0, %v36_v28  ;;  %518 = vmatpush.xpose.msk.msra.mxu0 %vm100_vm0, %v36_v28 }
  0x3d   :  { %351 = vperm.xlu2 %565, %v342_v46  }
  0x3f   :  { %457 = vperm.xlu0 %563, %v454_v36  }
  0x40   :  { %560 = vmatpush.xpose.msk.msra.mxu3 %vm100_vm0, %v35_v31  ;;  %519 = vmatpush.xpose.msk.msra.mxu0 %vm100_vm0, %v35_v31 }
  0x43   :  { %523 = vmatmul.msk.f32.vlgmr.msra.gmra.mxu3 %vm100_vm0, %v54_v33  ;;  %520 = vmatmul.msk.f32.vlgmr.msra.gmra.mxu0 %vm100_vm0, %v51_v34 }
  0x4b   :  { %524 = vmatmul.msk.f32.gmra.mxu3 %vm100_vm0, %v55_v38  ;;  %521 = vmatmul.msk.f32.gmra.mxu0 %vm100_vm0, %v52_v39 }
  0x53   :  { %525 = vmatmul.msk.f32.gmra.mxu3 %vm100_vm0, %v56_v41  ;;  %522 = vmatmul.msk.f32.gmra.mxu0 %vm100_vm0, %v53_v42 }
  0x5b   :  { %526 = vmatmul.msk.f32.gmra.mxu3 %vm100_vm0, %v57_v44 }
  0x67   :  { %v78_v54 = vpop.permute.xlu2 %77 }
  0x6f   :  { %v73_v0 = vpop.permute.xlu2 %72 }
  0x77   :  { %v257_v25 = vpop.permute.xlu2 %256 }
  0x79   :  { %v98_v50 = vpop.permute.xlu0 %97 }
  0x7b   :  { %v88_v52 = vpop.permute.xlu1 %87 }
  0x7f   :  { %v242_v33 = vpop.permute.xlu2 %241 }
  0x81   :  { %v93_v55 = vpop.permute.xlu0 %92 }
  0x83   :  { %v83_v60 = vpop.permute.xlu1 %82 }
  0x89   :  { %v68_v3 = vpop.permute.xlu0 %67 }
  0x8b   :  { %v262_v23 = vpop.permute.xlu1 %261 }
  0x91   :  { %v252_v26 = vpop.permute.xlu0 %251 }
  0x93   :  { %v247_v27 = vpop.permute.xlu1 %246 }
  0x99   :  { %v237_v35 = vpop.permute.xlu0 %236 }
  0x9b   :  { %v232_v38 = vpop.permute.xlu1 %231 }
  0xc0   :  { %v187_v49 = vpop.f32.mrf.mxu0 }
  0xc1   :  { %v188_v5 = vadd.f32 %v187_v49, %v68_v3  ;;  %v338_v49 = vld [vmem:[%s931_s5 + $0x18] sm:$0xff] }
  0xc6   :  { %v196_v47 = vpop.f32.mrf.mxu3 }
  0xc7   :  { %v197_v62 = vadd.f32 %v196_v47, %v83_v60  ;;  %v336_v47 = vld [vmem:[%s931_s5 + $0x8] sm:$0xff]  ;;  %v377_v60 = vpop.permute.xlu0 %376 }
  0xc8   :  { %v190_v53 = vpop.f32.mrf.mxu0 }
  0xc9   :  { %v191_v2 = vadd.f32 %v190_v53, %v73_v0 }
  0xce   :  { %v199_v48 = vpop.f32.mrf.mxu3 }
  0xcf   :  { %v200_v59 = vadd.f32 %v199_v48, %v88_v52  ;;  %v337_v48 = vld [vmem:[%s931_s5 + $0x10] sm:$0xff] }
  0xd0   :  { %v193_v61 = vpop.f32.mrf.mxu0  ;;  %v341_v52 = vld [vmem:[%s931_s5 + $0x30] sm:$0x3] }
  0xd1   :  { %v194_v63 = vadd.f32 %v193_v61, %v78_v54  ;;  %v372_v61 = vpop.permute.xlu1 %371 }
  0xd6   :  { %v202_v51 = vpop.f32.mrf.mxu3 }
  0xd7   :  { %v203_v57 = vadd.f32 %v202_v51, %v93_v55  ;;  %v340_v51 = vld [vmem:[%s931_s5 + $0x28] sm:$0xff] }
  0xde   :  { %v205_v56 = vpop.f32.mrf.mxu3 }
  0xdf   :  { %v206_v58 = vadd.f32 %v205_v56, %v98_v50  ;;  %v339_v50 = vld [vmem:[%s931_s5 + $0x20] sm:$0xff] }
  0xe1   :  { %566 = vtanh.f32 %v206_v58  ;;  %v382_v58 = vpop.permute.xlu2 %381 }
  0xe2   :  { %568 = vtanh.f32 %v203_v57 }
  0xe3   :  { %570 = vtanh.f32 %v200_v59 }
  0xe4   :  { %572 = vtanh.f32 %v197_v62 }
  0xe5   :  { %574 = vtanh.f32 %v194_v63 }
  0xe6   :  { %576 = vtanh.f32 %v191_v2 }
  0xe7   :  { %v567_v1 = vpop.eup %566  ;;  %578 = vtanh.f32 %v188_v5 }
  0xe8   :  { %527 = vmatpush.msk.msra.mxu1 %vm286_vm1, %v567_v1  ;;  %v569_v4 = vpop.eup %568 }
  0xe9   :  { %v571_v6 = vpop.eup %570  ;;  %v367_v62 = vpop.permute.xlu2 %366 }
  0xea   :  { %300 = vmatpush.msra.mxu1 %v569_v4  ;;  %v573_v7 = vpop.eup %572  ;;  %v362_v4 = vpop.permute.xlu0 %361 }
  0xeb   :  { %v575_v8 = vpop.eup %574 }
  0xec   :  { %301 = vmatpush.msra.mxu1 %v571_v6  ;;  %v577_v9 = vpop.eup %576  ;;  %v357_v6 = vpop.permute.xlu1 %356 }
  0xed   :  { %v579_v11 = vpop.eup %578 }
  0xee   :  { %302 = vmatpush.msra.mxu1 %v573_v7 }
  0xf0   :  { %303 = vmatpush.msra.mxu1 %v575_v8 }
  0xf2   :  { %304 = vmatpush.msra.mxu1 %v577_v9  ;;  %v352_v9 = vpop.permute.xlu2 %351 }
  0xf4   :  { %305 = vmatpush.msra.mxu1 %v579_v11 }
  0xf5   :  { %528 = vmatmul.msk.f32.vlgmr.msra.gmra.mxu1 %vm264_vm2, %v215_v10 }
  0xfd   :  { %529 = vmatmul.msk.f32.gmra.mxu1 %vm264_vm2, %v216_v12 }
 0x105   :  { %530 = vmatmul.msk.f32.gmra.mxu1 %vm264_vm2, %v217_v13 }
 0x10d   :  { %531 = vmatmul.msk.f32.gmra.mxu1 %vm264_vm2, %v218_v14 }
 0x115   :  { %532 = vmatmul.msk.f32.gmra.mxu1 %vm264_vm2, %v219_v15 }
 0x11d   :  { %533 = vmatmul.msk.f32.gmra.mxu1 %vm264_vm2, %v220_v16  ;;  %v453_v16 = vld [vmem:[%s933_s7] sm:$0x1] }
 0x125   :  { %534 = vmatmul.msk.f32.gmra.mxu1 %vm264_vm2, %v221_v17 }
 0x172   :  { %v307_v18 = vpop.f32.mrf.mxu1 }
 0x173   :  { %v308_v40 = vadd.f32 %v307_v18, %v232_v38  ;;  %v458_v18 = vpop.permute.xlu0 %457 }
 0x17a   :  { %v310_v19 = vpop.f32.mrf.mxu1 }
 0x17b   :  { %v311_v37 = vadd.f32 %v310_v19, %v237_v35  ;;  %v460_v19 = vperm.slane %v458_v18, 0 }
 0x182   :  { %v313_v20 = vpop.f32.mrf.mxu1 }
 0x183   :  { %v314_v34 = vadd.f32 %v313_v20, %v242_v33 }
 0x18a   :  { %v316_v21 = vpop.f32.mrf.mxu1 }
 0x18b   :  { %v317_v32 = vadd.f32 %v316_v21, %v247_v27 }
 0x192   :  { %v319_v22 = vpop.f32.mrf.mxu1 }
 0x193   :  { %v320_v31 = vadd.f32 %v319_v22, %v252_v26 }
 0x19a   :  { %v322_v24 = vpop.f32.mrf.mxu1 }
 0x19b   :  { %v323_v29 = vadd.f32 %v322_v24, %v257_v25 }
 0x1a2   :  { %v325_v28 = vpop.f32.mrf.mxu1 }
 0x1a3   :  { %v326_v30 = vadd.f32 %v325_v28, %v262_v23 }
 0x1a5   :  { %580 = vtanh.f32 %v326_v30 }
 0x1a6   :  { %582 = vtanh.f32 %v323_v29 }
 0x1a7   :  { %584 = vtanh.f32 %v320_v31 }
 0x1a8   :  { %586 = vtanh.f32 %v317_v32 }
 0x1a9   :  { %588 = vtanh.f32 %v314_v34 }
 0x1aa   :  { %590 = vtanh.f32 %v311_v37 }
 0x1ab   :  { %v581_v36 = vpop.eup %580  ;;  %592 = vtanh.f32 %v308_v40 }
 0x1ac   :  { %535 = vmatpush.msk.msra.mxu2 %vm286_vm1, %v581_v36  ;;  %v583_v39 = vpop.eup %582 }
 0x1ad   :  { %v585_v41 = vpop.eup %584 }
 0x1ae   :  { %418 = vmatpush.msra.mxu2 %v583_v39  ;;  %v587_v42 = vpop.eup %586 }
 0x1af   :  { %v589_v43 = vpop.eup %588 }
 0x1b0   :  { %419 = vmatpush.msra.mxu2 %v585_v41  ;;  %v591_v44 = vpop.eup %590 }
 0x1b1   :  { %v593_v46 = vpop.eup %592 }
 0x1b2   :  { %420 = vmatpush.msra.mxu2 %v587_v42 }
 0x1b4   :  { %421 = vmatpush.msra.mxu2 %v589_v43 }
 0x1b6   :  { %422 = vmatpush.msra.mxu2 %v591_v44 }
 0x1b8   :  { %423 = vmatpush.msra.mxu2 %v593_v46 }
 0x1b9   :  { %536 = vmatmul.msk.f32.vlgmr.msra.gmra.mxu2 %vm264_vm2, %v335_v45 }
 0x1c1   :  { %537 = vmatmul.msk.f32.gmra.mxu2 %vm264_vm2, %v336_v47 }
 0x1c9   :  { %538 = vmatmul.msk.f32.gmra.mxu2 %vm264_vm2, %v337_v48 }
 0x1d1   :  { %539 = vmatmul.msk.f32.gmra.mxu2 %vm264_vm2, %v338_v49 }
 0x1d9   :  { %540 = vmatmul.msk.f32.gmra.mxu2 %vm264_vm2, %v339_v50 }
 0x1e1   :  { %541 = vmatmul.msk.f32.gmra.mxu2 %vm264_vm2, %v340_v51 }
 0x1e9   :  { %542 = vmatmul.msk.f32.gmra.mxu2 %vm264_vm2, %v341_v52 }
 0x23c   :  { %v425_v53 = vpop.f32.mrf.mxu2 }
 0x23d   :  { %v426_v11 = vadd.f32 %v425_v53, %v352_v9 }
 0x244   :  { %v428_v54 = vpop.f32.mrf.mxu2 }
 0x245   :  { %v429_v8 = vadd.f32 %v428_v54, %v357_v6 }
 0x24c   :  { %v431_v55 = vpop.f32.mrf.mxu2 }
 0x24d   :  { %v432_v5 = vadd.f32 %v431_v55, %v362_v4 }
 0x254   :  { %v434_v56 = vpop.f32.mrf.mxu2 }
 0x255   :  { %v435_v3 = vadd.f32 %v434_v56, %v367_v62 }
 0x25c   :  { %v437_v57 = vpop.f32.mrf.mxu2 }
 0x25d   :  { %v438_v2 = vadd.f32 %v437_v57, %v372_v61 }
 0x264   :  { %v440_v59 = vpop.f32.mrf.mxu2 }
 0x265   :  { %v441_v0 = vadd.f32 %v440_v59, %v377_v60 }
 0x26c   :  { %v443_v63 = vpop.f32.mrf.mxu2 }
 0x26d   :  { %v444_v1 = vadd.f32 %v443_v63, %v382_v58 }
 0x26f   :  { %594 = vtanh.f32 %v444_v1 }
 0x270   :  { %596 = vtanh.f32 %v441_v0 }
 0x271   :  { %598 = vtanh.f32 %v438_v2 }
 0x272   :  { %600 = vtanh.f32 %v435_v3 }
 0x273   :  { %602 = vtanh.f32 %v432_v5 }
 0x274   :  { %604 = vtanh.f32 %v429_v8 }
 0x275   :  { %v595_v7 = vpop.eup %594  ;;  %606 = vtanh.f32 %v426_v11 }
 0x276   :  { %543 = vmatpush.msk.msrb.mxu1 %vm286_vm1, %v595_v7  ;;  %v597_v10 = vpop.eup %596 }
 0x277   :  { %v599_v12 = vpop.eup %598 }
 0x278   :  { %477 = vmatpush.msrb.mxu1 %v597_v10  ;;  %v601_v13 = vpop.eup %600 }
 0x279   :  { %v603_v14 = vpop.eup %602 }
 0x27a   :  { %478 = vmatpush.msrb.mxu1 %v599_v12  ;;  %v605_v15 = vpop.eup %604 }
 0x27b   :  { %v607_v17 = vpop.eup %606 }
 0x27c   :  { %479 = vmatpush.msrb.mxu1 %v601_v13 }
 0x27e   :  { %480 = vmatpush.msrb.mxu1 %v603_v14 }
 0x280   :  { %481 = vmatpush.msrb.mxu1 %v605_v15 }
 0x282   :  { %482 = vmatpush.msrb.mxu1 %v607_v17 }
 0x283   :  { %544 = vmatmul.msk.f32.vlgmr.msrb.gmra.mxu1 %vm264_vm2, %v453_v16 }
 0x300   :  { %v484_v20 = vpop.f32.mrf.mxu1 }
 0x301   :  { %v485_v21 = vadd.f32 %v484_v20, %v460_v19 }
 0x303   :  { %487 = vst [vmem:[#allocation3] sm:$0x1] %v485_v21 }
 0x304   :  { %498 = dma.vmem_to_hbm [thread:$0]  %s494_s28, 16, %s496_s0, [#allocation4]  }
 0x305   :  { %632 = dma.done.wait [#allocation4], 16  }
 0x306   :  { %633 = vsyncadd [#allocation4], 4294967280 }
 0x307   :  { %503 = vsyncpa [#allocation4], 1 }

</bundles_post_ra>
